<compile_context>
chip_gen: v7x
topology: tpu7x:2x2x1
jax: 0.10.0
libtpu: 0.0.40
codegen_flags: <defaults>
</compile_context>

<pallas_src>
import jax
import jax.numpy as jnp
from jax import lax
from jax.experimental import pallas as pl
from jax.experimental.pallas import tpu as pltpu

NUM_HOSTS = 20        # Embedding(20, dim)
OPS_IN = 6            # Linear(6, dim)
EPS = 1e-5            # BatchNorm1d default eps

FRONT_W = 32          # width of the packed front operand / packed input
HOST_COL = 6          # host-index lane of the packed input
ONES_COL = 7          # constant-1 lane (absorbs the fused front bias)

# Weight-slab row layout (lane width 2d, all region starts multiples of 8):
R_OPS = 0             # rows [0, 6)        : W_ops  = wo  @ w1[:d]
R_BIAS = 7            # row 7              : fused front bias (bo@w1[:d] + b1)
R_HOST = 8            # rows [8, 28)       : W_host = emb @ w1[d:]
R_W2 = FRONT_W        # rows [32, 32+2d)   : W2 padded (cols [0,d) real)
                      # rows [32+2d,32+4d) : w3 stored as a column in lane 0

# Vector-slab (8, 2d) f32 row layout:
V_G1, V_G2, V_R2B, V_C3 = 0, 1, 2, 3
# V_G1  : gamma1                     V_G2 : gamma2 (zero-padded)
# V_R2B : be1 @ W2 + b2 (row)        V_C3 : be2 @ w3 + b3 (lane 0)


def _mlp_kernel(xin_ref, wmat_ref, vec_ref, out_ref):
    f32 = jnp.float32
    b = xin_ref.shape[0]
    d2 = wmat_ref.shape[1]                 # 2 * dim
    cdt = wmat_ref.dtype                   # MXU operand dtype (bf16 in prod)
    inv_b = 1.0 / b

    vec = vec_ref[...]                                   # (8, d2) f32
    g1 = vec[V_G1:V_G1 + 1, :]
    g2 = vec[V_G2:V_G2 + 1, :]
    r2_base = vec[V_R2B:V_R2B + 1, :]                    # be1 @ W2 + b2
    c3 = vec[V_C3:V_C3 + 1, 0:1]                         # be2 @ w3 + b3

    # ---- fused front end: ONE dot of [ops | junk | 1 | onehot(host)] ------
    xin = xin_ref[...]                                   # (B, 32) f32
    idx = xin[:, HOST_COL:HOST_COL + 1].astype(jnp.int32)
    lane = lax.broadcasted_iota(jnp.int32, (b, FRONT_W), 1)
    onehot = ((lane - R_HOST) == idx).astype(f32)        # lanes 8..27 only
    # lane 6 still holds the raw host index: wmat row 6 is all-zero, so it
    # contributes nothing; lane 7 is the constant 1 that picks up row 7 (bias).
    front = xin + onehot

    h1 = jnp.dot(front.astype(cdt), wmat_ref[0:FRONT_W, :],
                 preferred_element_type=f32)             # (B, d2), bias folded
    h1 = jnp.maximum(h1, 0.0)                            # ReLU

    # ---- BatchNorm1d(2d): batch stats, column sums on the MXU, math in f32 -
    ones_row = jnp.ones((1, b), f32)
    mu1 = jnp.dot(ones_row, h1, preferred_element_type=f32) * inv_b
    ms1 = jnp.dot(ones_row, h1 * h1, preferred_element_type=f32) * inv_b
    scale1 = g1 * lax.rsqrt(ms1 - mu1 * mu1 + EPS)       # (1, d2)

    # ---- BN1 folded weight-side into layer 2: z2 = h1 @ (diag(scale1)@W2)+r2
    eye = (lax.broadcasted_iota(jnp.int32, (d2, d2), 0)
           == lax.broadcasted_iota(jnp.int32, (d2, d2), 1))
    w2 = wmat_ref[R_W2:R_W2 + d2, :].astype(f32)         # (d2, d2), pad cols 0
    w2s = jnp.dot(jnp.where(eye, jnp.broadcast_to(scale1, (d2, d2)), 0.0), w2,
                  preferred_element_type=f32)            # diag(scale1) @ W2
    # shift1 @ W2 + b2 = (be1 @ W2 + b2) - (mu1 * scale1) @ W2
    r2 = r2_base - jnp.dot(mu1 * scale1, w2, preferred_element_type=f32)

    h2 = jnp.dot(h1.astype(cdt), w2s.astype(cdt),
                 preferred_element_type=f32) + r2        # (B, d2)
    h2 = jnp.maximum(h2, 0.0)                            # ReLU

    # ---- BatchNorm1d(d) stats (padded lanes stay exactly 0: gamma2 pad = 0) -
    mu2 = jnp.dot(ones_row, h2, preferred_element_type=f32) * inv_b
    ms2 = jnp.dot(ones_row, h2 * h2, preferred_element_type=f32) * inv_b
    scale2 = g2 * lax.rsqrt(ms2 - mu2 * mu2 + EPS)       # (1, d2)

    # ---- BN2 folded into the final matvec: out = h2 @ (diag(scale2)@w3) + r3
    w3c = wmat_ref[R_W2 + d2:R_W2 + 2 * d2, :].astype(f32)[:, 0:1]   # (d2, 1)
    w3s = jnp.dot(jnp.where(eye, jnp.broadcast_to(scale2, (d2, d2)), 0.0), w3c,
                  preferred_element_type=f32)            # (d2, 1)
    r3 = c3 - jnp.dot(mu2 * scale2, w3c, preferred_element_type=f32)  # (1, 1)

    out_ref[...] = jnp.dot(h2.astype(cdt), w3s.astype(cdt),
                           preferred_element_type=f32) + r3           # (B, 1)


def prepare_params(params, compute_dtype=jnp.bfloat16):
    """One-time fold/pack of all module parameters into two slabs.

    Returns (wmat, vec):
      wmat : (32 + 4*dim, 2*dim) compute_dtype  -- MXU weight slab
      vec  : (8, 2*dim) float32                 -- f32 rows used by the BN folds
    Hoisted out of the per-call forward (perf-review item 1).
    """
    f32 = jnp.float32
    dim = params["wo"].shape[1]
    d2 = 2 * dim

    # Fold Linear(6,dim) and Embedding(20,dim) into Linear(2d,2d) (no
    # nonlinearity in between).
    w1a = params["w1"][:dim].astype(f32)                 # (dim, 2d)
    w1b = params["w1"][dim:].astype(f32)                 # (dim, 2d)
    w_ops = params["wo"].astype(f32) @ w1a               # (6, 2d)
    w_host = params["emb"].astype(f32) @ w1b             # (20, 2d)
    b_fused = params["bo"].astype(f32) @ w1a + params["b1"]   # (1, 2d)

    # Zero-pad layer 2/3 to lane width 2d.  Padded gamma2/b2/beta2/w3 entries
    # MUST stay 0 (padded-column invariant).  Free at dim=32 (2d=64 <= 128
    # lanes); for dim >= 64 pad only to the next multiple of 128 instead.
    w2p = jnp.zeros((d2, d2), f32).at[:, :dim].set(params["w2"])
    b2p = jnp.zeros((1, d2), f32).at[:, :dim].set(params["b2"])
    g2p = jnp.zeros((1, d2), f32).at[:, :dim].set(params["g2"])
    w3p = jnp.zeros((d2,), f32).at[:dim].set(params["w3"][:, 0])

    wmat = jnp.zeros((R_W2 + 2 * d2, d2), f32)
    wmat = wmat.at[R_OPS:R_OPS + OPS_IN].set(w_ops)
    wmat = wmat.at[R_BIAS].set(b_fused[0])               # rides constant-1 lane
    wmat = wmat.at[R_HOST:R_HOST + NUM_HOSTS].set(w_host)
    wmat = wmat.at[R_W2:R_W2 + d2].set(w2p)
    wmat = wmat.at[R_W2 + d2:, 0].set(w3p)               # w3 stored as a column

    vec = jnp.zeros((8, d2), f32)
    vec = vec.at[V_G1].set(params["g1"][0])
    vec = vec.at[V_G2].set(g2p[0])
    vec = vec.at[V_R2B].set((params["be1"] @ w2p + b2p)[0])            # be1@W2 + b2
    vec = vec.at[V_C3, 0].set((params["be2"] @ params["w3"]
                               + params["b3"])[0, 0])                  # be2@w3 + b3
    return wmat.astype(compute_dtype), vec


@jax.jit
def mlp_predictor_v2(ops, host, wmat, vec):
    """Forward pass; wmat/vec come from prepare_params (built once)."""
    f32 = jnp.float32
    B = ops.shape[0]
    # Single packed input: [ops(6) | host_idx(1) | 1.0(1) | zeros(24)].
    xin = jnp.concatenate(
        [ops.astype(f32),
         host.astype(f32).reshape(B, 1),
         jnp.ones((B, 1), f32),
         jnp.zeros((B, FRONT_W - OPS_IN - 2), f32)], axis=1)

    vmem = pl.BlockSpec(memory_space=pltpu.MemorySpace.VMEM)
    out = pl.pallas_call(
        _mlp_kernel,
        out_shape=jax.ShapeDtypeStruct((B, 1), jnp.float32),
        in_specs=[vmem, vmem, vmem],
        out_specs=vmem,
        compiler_params=pltpu.CompilerParams(
            vmem_limit_bytes=32 * 1024 * 1024),   # safe on v5e/v6e/v7x
    )(xin, wmat, vec)
    return out.reshape(B)     # == .squeeze() of the torch module


def init_params(key, dim=32):
    ks = jax.random.split(key, 9)
    s = 0.1
    return {
        "wo":  jax.random.normal(ks[0], (OPS_IN, dim), jnp.float32) * s,
        "bo":  jax.random.normal(ks[1], (1, dim), jnp.float32) * s,
        "emb": jax.random.normal(ks[2], (NUM_HOSTS, dim), jnp.float32) * s,
        "w1":  jax.random.normal(ks[3], (2 * dim, 2 * dim), jnp.float32) * s,
        "b1":  jax.random.normal(ks[4], (1, 2 * dim), jnp.float32) * s,
        "g1":  jnp.ones((1, 2 * dim), jnp.float32),
        "be1": jnp.zeros((1, 2 * dim), jnp.float32),
        "w2":  jax.random.normal(ks[5], (2 * dim, dim), jnp.float32) * s,
        "b2":  jax.random.normal(ks[6], (1, dim), jnp.float32) * s,
        "g2":  jnp.ones((1, dim), jnp.float32),
        "be2": jnp.zeros((1, dim), jnp.float32),
        "w3":  jax.random.normal(ks[7], (dim, 1), jnp.float32) * s,
        "b3":  jax.random.normal(ks[8], (1, 1), jnp.float32) * s,
    }


def ref_forward(ops, host, params):
    """Pure-JAX reference mirroring the PyTorch forward (unfused, f32)."""
    ops_emb = ops.astype(jnp.float32) @ params["wo"] + params["bo"]
    host_emb = params["emb"][host]
    x = jnp.concatenate([ops_emb, host_emb], axis=-1)
    h = jnp.maximum(x @ params["w1"] + params["b1"], 0.0)
    mu = h.mean(0, keepdims=True)
    var = ((h - mu) ** 2).mean(0, keepdims=True)
    h = (h - mu) / jnp.sqrt(var + EPS) * params["g1"] + params["be1"]
    h = jnp.maximum(h @ params["w2"] + params["b2"], 0.0)
    mu = h.mean(0, keepdims=True)
    var = ((h - mu) ** 2).mean(0, keepdims=True)
    h = (h - mu) / jnp.sqrt(var + EPS) * params["g2"] + params["be2"]
    return (h @ params["w3"] + params["b3"]).squeeze()


if __name__ == "__main__":
    dim = 32
    B = 128     # small batch; train-mode BatchNorm wants a healthy batch
    key = jax.random.PRNGKey(0)
    k_ops, k_host, k_param = jax.random.split(key, 3)

    ops = jax.random.normal(k_ops, (B, OPS_IN), jnp.float32)
    host = jax.random.randint(k_host, (B,), 0, NUM_HOSTS, jnp.int32)
    params = init_params(k_param, dim=dim)

    ref = ref_forward(ops, host, params)

    # 1) Strict structural-correctness check: same kernel, f32 weight slab.
    wmat32, vec32 = prepare_params(params, compute_dtype=jnp.float32)
    out32 = jax.block_until_ready(mlp_predictor_v2(ops, host, wmat32, vec32))
    assert out32.shape == (B,)
    assert jnp.allclose(out32, ref, atol=2e-3, rtol=2e-3), (
        float(jnp.max(jnp.abs(out32 - ref))))

    # 2) Production variant: bf16 MXU operands (per perf review), f32
    #    accumulation/stats.  Looser tolerance reflects only bf16 operand
    #    rounding (output scale ~0.5); any structural bug would be O(1).
    wmat16, vec16 = prepare_params(params, compute_dtype=jnp.bfloat16)
    out16 = jax.block_until_ready(mlp_predictor_v2(ops, host, wmat16, vec16))
    assert out16.shape == (B,)
    assert jnp.allclose(out16, ref, atol=6e-2, rtol=6e-2), (
        float(jnp.max(jnp.abs(out16 - ref))))

    print("KERNEL_OK")
</pallas_src>

<mosaic_0001>
module attributes {stable_mosaic.version = 11 : i64} {
  func.func @_mlp_kernel(%arg0: memref<128x32xf32, #tpu.memory_space<vmem>>, %arg1: memref<160x64xf32, #tpu.memory_space<vmem>>, %arg2: memref<8x64xf32, #tpu.memory_space<vmem>>, %arg3: memref<128x1xf32, #tpu.memory_space<vmem>>) attributes {dimension_semantics = [], scalar_prefetch = 0 : i64, scratch_operands = 0 : i64, tpu.core_type = #tpu.core_type<tc>} {
    %c0 = arith.constant 0 : index
    %c0_0 = arith.constant 0 : index
    %0 = vector.load %arg2[%c0, %c0_0] : memref<8x64xf32, #tpu.memory_space<vmem>>, vector<8x64xf32>
    %1 = vector.extract_strided_slice %0 {offsets = [0, 0], sizes = [1, 64], strides = [1, 1]} : vector<8x64xf32> to vector<1x64xf32>
    %2 = vector.extract_strided_slice %0 {offsets = [1, 0], sizes = [1, 64], strides = [1, 1]} : vector<8x64xf32> to vector<1x64xf32>
    %3 = vector.extract_strided_slice %0 {offsets = [2, 0], sizes = [1, 64], strides = [1, 1]} : vector<8x64xf32> to vector<1x64xf32>
    %4 = vector.extract_strided_slice %0 {offsets = [3, 0], sizes = [1, 1], strides = [1, 1]} : vector<8x64xf32> to vector<1x1xf32>
    %c0_1 = arith.constant 0 : index
    %c0_2 = arith.constant 0 : index
    %5 = vector.load %arg0[%c0_1, %c0_2] : memref<128x32xf32, #tpu.memory_space<vmem>>, vector<128x32xf32>
    %6 = vector.extract_strided_slice %5 {offsets = [0, 6], sizes = [128, 1], strides = [1, 1]} : vector<128x32xf32> to vector<128x1xf32>
    %7 = arith.fptosi %6 : vector<128x1xf32> to vector<128x1xi32>
    %8 = tpu.iota {dimensions = array<i32: 1>} : vector<128x32xi32>
    %c8_i32 = arith.constant 8 : i32
    %9 = vector.broadcast %c8_i32 : i32 to vector<128x32xi32>
    %10 = arith.subi %8, %9 : vector<128x32xi32>
    %11 = vector.broadcast %7 : vector<128x1xi32> to vector<128x32xi32>
    %12 = arith.cmpi eq, %10, %11 : vector<128x32xi32>
    %13 = arith.extui %12 : vector<128x32xi1> to vector<128x32xi32>
    %14 = arith.sitofp %13 : vector<128x32xi32> to vector<128x32xf32>
    %15 = arith.addf %5, %14 : vector<128x32xf32>
    %c0_3 = arith.constant 0 : index
    %c0_4 = arith.constant 0 : index
    %16 = vector.load %arg1[%c0_3, %c0_4] : memref<160x64xf32, #tpu.memory_space<vmem>>, vector<32x64xf32>
    %cst = arith.constant dense<0.000000e+00> : vector<128x64xf32>
    %17 = tpu.matmul %15, %16, %cst {dimension_numbers = #tpu.dot_dimension_numbers<[1], [0], [0], [1], [0, 0, 1, 1], [], []>} : vector<128x32xf32>, vector<32x64xf32>, vector<128x64xf32> -> vector<128x64xf32>
    %cst_5 = arith.constant 0.000000e+00 : f32
    %18 = vector.broadcast %cst_5 : f32 to vector<128x64xf32>
    %19 = arith.maximumf %17, %18 : vector<128x64xf32>
    %cst_6 = arith.constant 1.000000e+00 : f32
    %20 = vector.broadcast %cst_6 : f32 to vector<1x128xf32>
    %cst_7 = arith.constant dense<0.000000e+00> : vector<1x64xf32>
    %21 = tpu.matmul %20, %19, %cst_7 {dimension_numbers = #tpu.dot_dimension_numbers<[1], [0], [0], [1], [0, 0, 1, 1], [], []>} : vector<1x128xf32>, vector<128x64xf32>, vector<1x64xf32> -> vector<1x64xf32>
    %cst_8 = arith.constant 7.812500e-03 : f32
    %22 = vector.broadcast %cst_8 : f32 to vector<1x64xf32>
    %23 = arith.mulf %21, %22 : vector<1x64xf32>
    %24 = arith.mulf %19, %19 : vector<128x64xf32>
    %cst_9 = arith.constant dense<0.000000e+00> : vector<1x64xf32>
    %25 = tpu.matmul %20, %24, %cst_9 {dimension_numbers = #tpu.dot_dimension_numbers<[1], [0], [0], [1], [0, 0, 1, 1], [], []>} : vector<1x128xf32>, vector<128x64xf32>, vector<1x64xf32> -> vector<1x64xf32>
    %cst_10 = arith.constant 7.812500e-03 : f32
    %26 = vector.broadcast %cst_10 : f32 to vector<1x64xf32>
    %27 = arith.mulf %25, %26 : vector<1x64xf32>
    %28 = arith.mulf %23, %23 : vector<1x64xf32>
    %29 = arith.subf %27, %28 : vector<1x64xf32>
    %cst_11 = arith.constant 9.99999974E-6 : f32
    %30 = vector.broadcast %cst_11 : f32 to vector<1x64xf32>
    %31 = arith.addf %29, %30 : vector<1x64xf32>
    %32 = math.rsqrt %31 : vector<1x64xf32>
    %33 = arith.mulf %1, %32 : vector<1x64xf32>
    %34 = tpu.iota {dimensions = array<i32: 0>} : vector<64x64xi32>
    %35 = tpu.iota {dimensions = array<i32: 1>} : vector<64x64xi32>
    %36 = arith.cmpi eq, %34, %35 : vector<64x64xi32>
    %c32 = arith.constant 32 : index
    %c0_12 = arith.constant 0 : index
    %37 = vector.load %arg1[%c32, %c0_12] : memref<160x64xf32, #tpu.memory_space<vmem>>, vector<64x64xf32>
    %38 = vector.shape_cast %33 : vector<1x64xf32> to vector<1x64xf32>
    %39 = vector.broadcast %38 : vector<1x64xf32> to vector<64x64xf32>
    %cst_13 = arith.constant 0.000000e+00 : f32
    %40 = vector.broadcast %cst_13 : f32 to vector<64x64xf32>
    %41 = arith.select %36, %39, %40 : vector<64x64xi1>, vector<64x64xf32>
    %cst_14 = arith.constant dense<0.000000e+00> : vector<64x64xf32>
    %42 = tpu.matmul %41, %37, %cst_14 {dimension_numbers = #tpu.dot_dimension_numbers<[1], [0], [0], [1], [0, 0, 1, 1], [], []>} : vector<64x64xf32>, vector<64x64xf32>, vector<64x64xf32> -> vector<64x64xf32>
    %43 = arith.mulf %23, %33 : vector<1x64xf32>
    %cst_15 = arith.constant dense<0.000000e+00> : vector<1x64xf32>
    %44 = tpu.matmul %43, %37, %cst_15 {dimension_numbers = #tpu.dot_dimension_numbers<[1], [0], [0], [1], [0, 0, 1, 1], [], []>} : vector<1x64xf32>, vector<64x64xf32>, vector<1x64xf32> -> vector<1x64xf32>
    %45 = arith.subf %3, %44 : vector<1x64xf32>
    %cst_16 = arith.constant dense<0.000000e+00> : vector<128x64xf32>
    %46 = tpu.matmul %19, %42, %cst_16 {dimension_numbers = #tpu.dot_dimension_numbers<[1], [0], [0], [1], [0, 0, 1, 1], [], []>} : vector<128x64xf32>, vector<64x64xf32>, vector<128x64xf32> -> vector<128x64xf32>
    %47 = vector.broadcast %45 : vector<1x64xf32> to vector<128x64xf32>
    %48 = arith.addf %46, %47 : vector<128x64xf32>
    %cst_17 = arith.constant 0.000000e+00 : f32
    %49 = vector.broadcast %cst_17 : f32 to vector<128x64xf32>
    %50 = arith.maximumf %48, %49 : vector<128x64xf32>
    %cst_18 = arith.constant dense<0.000000e+00> : vector<1x64xf32>
    %51 = tpu.matmul %20, %50, %cst_18 {dimension_numbers = #tpu.dot_dimension_numbers<[1], [0], [0], [1], [0, 0, 1, 1], [], []>} : vector<1x128xf32>, vector<128x64xf32>, vector<1x64xf32> -> vector<1x64xf32>
    %cst_19 = arith.constant 7.812500e-03 : f32
    %52 = vector.broadcast %cst_19 : f32 to vector<1x64xf32>
    %53 = arith.mulf %51, %52 : vector<1x64xf32>
    %54 = arith.mulf %50, %50 : vector<128x64xf32>
    %cst_20 = arith.constant dense<0.000000e+00> : vector<1x64xf32>
    %55 = tpu.matmul %20, %54, %cst_20 {dimension_numbers = #tpu.dot_dimension_numbers<[1], [0], [0], [1], [0, 0, 1, 1], [], []>} : vector<1x128xf32>, vector<128x64xf32>, vector<1x64xf32> -> vector<1x64xf32>
    %cst_21 = arith.constant 7.812500e-03 : f32
    %56 = vector.broadcast %cst_21 : f32 to vector<1x64xf32>
    %57 = arith.mulf %55, %56 : vector<1x64xf32>
    %58 = arith.mulf %53, %53 : vector<1x64xf32>
    %59 = arith.subf %57, %58 : vector<1x64xf32>
    %cst_22 = arith.constant 9.99999974E-6 : f32
    %60 = vector.broadcast %cst_22 : f32 to vector<1x64xf32>
    %61 = arith.addf %59, %60 : vector<1x64xf32>
    %62 = math.rsqrt %61 : vector<1x64xf32>
    %63 = arith.mulf %2, %62 : vector<1x64xf32>
    %c96 = arith.constant 96 : index
    %c0_23 = arith.constant 0 : index
    %64 = vector.load %arg1[%c96, %c0_23] : memref<160x64xf32, #tpu.memory_space<vmem>>, vector<64x64xf32>
    %65 = vector.extract_strided_slice %64 {offsets = [0, 0], sizes = [64, 1], strides = [1, 1]} : vector<64x64xf32> to vector<64x1xf32>
    %66 = vector.shape_cast %63 : vector<1x64xf32> to vector<1x64xf32>
    %67 = vector.broadcast %66 : vector<1x64xf32> to vector<64x64xf32>
    %cst_24 = arith.constant 0.000000e+00 : f32
    %68 = vector.broadcast %cst_24 : f32 to vector<64x64xf32>
    %69 = arith.select %36, %67, %68 : vector<64x64xi1>, vector<64x64xf32>
    %cst_25 = arith.constant dense<0.000000e+00> : vector<64x1xf32>
    %70 = tpu.matmul %69, %65, %cst_25 {dimension_numbers = #tpu.dot_dimension_numbers<[1], [0], [0], [1], [0, 0, 1, 1], [], []>} : vector<64x64xf32>, vector<64x1xf32>, vector<64x1xf32> -> vector<64x1xf32>
    %71 = arith.mulf %53, %63 : vector<1x64xf32>
    %cst_26 = arith.constant dense<0.000000e+00> : vector<1x1xf32>
    %72 = tpu.matmul %71, %65, %cst_26 {dimension_numbers = #tpu.dot_dimension_numbers<[1], [0], [0], [1], [0, 0, 1, 1], [], []>} : vector<1x64xf32>, vector<64x1xf32>, vector<1x1xf32> -> vector<1x1xf32>
    %73 = arith.subf %4, %72 : vector<1x1xf32>
    %cst_27 = arith.constant dense<0.000000e+00> : vector<128x1xf32>
    %74 = tpu.matmul %50, %70, %cst_27 {dimension_numbers = #tpu.dot_dimension_numbers<[1], [0], [0], [1], [0, 0, 1, 1], [], []>} : vector<128x64xf32>, vector<64x1xf32>, vector<128x1xf32> -> vector<128x1xf32>
    %75 = vector.broadcast %73 : vector<1x1xf32> to vector<128x1xf32>
    %76 = arith.addf %74, %75 : vector<128x1xf32>
    %c0_28 = arith.constant 0 : index
    %c0_29 = arith.constant 0 : index
    %77 = vector.load %arg3[%c0_28, %c0_29] : memref<128x1xf32, #tpu.memory_space<vmem>>, vector<128x1xf32>
    tpu.vector_store %arg3[%c0_28, %c0_29], %76 {strides = array<i32>} : memref<128x1xf32, #tpu.memory_space<vmem>>, vector<128x1xf32>,
    return
  }
}

</mosaic_0001>

<bundles_post_ra>
// kernel: mlp_predictor_v2.1
= control target key start
LH: loop header
LB: loop body
LE: loop exit
PB: predicated region body
PF: predicated region fallthrough
CT: control target
= control target key end

     0   :  { %v2461_v0 = vmov 6   ;;  %v47_v55 = vlaneseq  ;;  %v2462_v60 = vmov 0.0   ;;  %vm166_vm2 = vcmask 261120   ;;  %s3193_s0 = inlined_call_operand.vmem [shape: f32[128,32], index: 0, kind: input, shape index: {}]   ;;  %s3194_s1 = inlined_call_operand.vmem [shape: f32[160,64], index: 1, kind: input, shape index: {}]   ;;  %s3195_s2 = inlined_call_operand.vmem [shape: f32[8,64], index: 2, kind: input, shape index: {}]   ;;  %s3196_s3 = inlined_call_operand.vmem [shape: f32[128,1], index: 3, kind: output, shape index: {}]  }
   0x1   :  { %2456 = vset.pattern.permute.xlu1 %v2461_v0  ;;  %2455 = vset.pattern.permute.xlu0 %v2461_v0  ;;  %v2489_v1 = vld [vmem:[%s3193_s0 + $0x10] sm:$0xff]  ;;  %v2494_v2 = vld [vmem:[%s3193_s0] sm:$0xff]  ;;  %v2499_v3 = vld [vmem:[%s3193_s0 + $0x18] sm:$0xff] }
   0x2   :  { %v2422_v4 = vtrunc.f32 %v2489_v1  ;;  %v2418_v5 = vtrunc.f32 %v2494_v2  ;;  %v2424_v6 = vtrunc.f32 %v2499_v3  ;;  %v2507_v7 = vld [vmem:[%s3193_s0 + $0x8] sm:$0xff]  ;;  %v2518_v10 = vld [vmem:[%s3193_s0 + $0x20] sm:$0xff]  ;;  %v2525_v17 = vld [vmem:[%s3193_s0 + $0x38] sm:$0xff]  ;;  %v2595_v56 = vand.u32 127, %v47_v55 }
   0x3   :  { %v2420_v8 = vtrunc.f32 %v2507_v7  ;;  %v2513_v9 = vld [vmem:[%s3193_s0 + $0x28] sm:$0xff]  ;;  %v2426_v16 = vtrunc.f32 %v2518_v10  ;;  %v2530_v18 = vld [vmem:[%s3193_s0 + $0x30] sm:$0xff]  ;;  %v162_v19 = vld [vmem:[%s3194_s1] sm:$0xff]  ;;  %v2432_v23 = vtrunc.f32 %v2525_v17 }
   0x4   :  { %v2423_v11 = vcvt.f32.s32 %v2422_v4  ;;  %v2419_v12 = vcvt.f32.s32 %v2418_v5  ;;  %v2425_v13 = vcvt.f32.s32 %v2424_v6  ;;  %v2428_v15 = vtrunc.f32 %v2513_v9  ;;  %v163_v20 = vld [vmem:[%s3194_s1 + $0x8] sm:$0xff]  ;;  %v164_v21 = vld [vmem:[%s3194_s1 + $0x10] sm:$0xff]  ;;  %v165_v22 = vld [vmem:[%s3194_s1 + $0x18] sm:$0xff] }
   0x5   :  { %v2421_v14 = vcvt.f32.s32 %v2420_v8  ;;  %v2427_v25 = vcvt.f32.s32 %v2426_v16  ;;  %v2430_v26 = vtrunc.f32 %v2530_v18  ;;  %v2226_v27 = vpack.c.bf16 %v163_v20, %v162_v19  ;;  %v2549_v28 = vld [vmem:[%s3193_s0 + $0x48] sm:$0xff]  ;;  %v2554_v29 = vld [vmem:[%s3193_s0 + $0x40] sm:$0xff]  ;;  %v2561_v35 = vld [vmem:[%s3193_s0 + $0x58] sm:$0xff] }
   0x6   :  { %57 = vperm.xlu1 %2456, %v2423_v11   ;;  %51 = vperm.xlu0 %2455, %v2419_v12   ;;  %v2429_v24 = vcvt.f32.s32 %v2428_v15  ;;  %v2230_v30 = vpack.c.bf16 %v165_v22, %v164_v21  ;;  %v2433_v31 = vcvt.f32.s32 %v2432_v23  ;;  %v2436_v33 = vtrunc.f32 %v2549_v28  ;;  %v2566_v36 = vld [vmem:[%s3193_s0 + $0x50] sm:$0xff]  ;;  %v2573_v41 = vld [vmem:[%s3193_s0 + $0x68] sm:$0xff]  ;;  %v2578_v42 = vld [vmem:[%s3193_s0 + $0x60] sm:$0xff] }
   0x7   :  { %2227 = vmatprep.subr.bf16.mxu0 %v2226_v27  ;;  %v2431_v32 = vcvt.f32.s32 %v2430_v26  ;;  %v2434_v34 = vtrunc.f32 %v2554_v29  ;;  %v2440_v39 = vtrunc.f32 %v2561_v35  ;;  %v2438_v40 = vtrunc.f32 %v2566_v36  ;;  %v2585_v47 = vld [vmem:[%s3193_s0 + $0x78] sm:$0xff]  ;;  %v2590_v48 = vld [vmem:[%s3193_s0 + $0x70] sm:$0xff] }
   0x8   :  { %2229 = vmatpush3.bf16.msra.mxu0 %v2226_v27  ;;  %v2437_v37 = vcvt.f32.s32 %v2436_v33  ;;  %v2444_v45 = vtrunc.f32 %v2573_v41  ;;  %v2442_v46 = vtrunc.f32 %v2578_v42  ;;  %v2448_v51 = vtrunc.f32 %v2585_v47 }
   0x9   :  { %2231 = vmatprep.subr.bf16.mxu0 %v2230_v30  ;;  %v2435_v38 = vcvt.f32.s32 %v2434_v34  ;;  %v2441_v43 = vcvt.f32.s32 %v2440_v39  ;;  %v2439_v44 = vcvt.f32.s32 %v2438_v40  ;;  %v2446_v52 = vtrunc.f32 %v2590_v48 }
   0xa   :  { %60 = vperm.xlu1 %2456, %v2425_v13   ;;  %54 = vperm.xlu0 %2455, %v2421_v14   ;;  %v2445_v49 = vcvt.f32.s32 %v2444_v45  ;;  %v2443_v50 = vcvt.f32.s32 %v2442_v46  ;;  %v2449_v53 = vcvt.f32.s32 %v2448_v51  ;;  %v2598_v57 = vadd.s32 4294967288, %v2595_v56 }
   0xb   :  { %v2447_v54 = vcvt.f32.s32 %v2446_v52 }
   0xc   :  { %2233 = vmatpush3.bf16.msra.mxu0 %v2230_v30 }
   0xe   :  { %66 = vperm.xlu1 %2456, %v2429_v24   ;;  %63 = vperm.xlu0 %2455, %v2427_v25  }
  0x12   :  { %72 = vperm.xlu1 %2456, %v2433_v31   ;;  %69 = vperm.xlu0 %2455, %v2431_v32  }
  0x16   :  { %78 = vperm.xlu1 %2456, %v2437_v37   ;;  %75 = vperm.xlu0 %2455, %v2435_v38  }
  0x1a   :  { %84 = vperm.xlu1 %2456, %v2441_v43   ;;  %81 = vperm.xlu0 %2455, %v2439_v44   ;;  %v2463_v44 = vmov 0.0|0.0  }
  0x1b   :  { %2234 = vmatprep.subr.bf16.mxu1 %v2463_v44  ;;  %2258 = vmatprep.subr.bf16.mxu0 %v2463_v44 }
  0x1e   :  { %90 = vperm.xlu1 %2456, %v2445_v49   ;;  %87 = vperm.xlu0 %2455, %v2443_v50  }
  0x22   :  { %96 = vperm.xlu1 %2456, %v2449_v53   ;;  %93 = vperm.xlu0 %2455, %v2447_v54  }
  0x85   :  { %v58_v58 = vpop.permute.xlu1 %57  ;;  %v52_v59 = vpop.permute.xlu0 %51 }
  0x86   :  { %vm100_vm0 = vcmp.eq.s32.totalorder %v2598_v57, %v58_v58  ;;  %vm98_vm1 = vcmp.eq.s32.totalorder %v2598_v57, %v52_v59 }
  0x87   :  { %v1612_v61 = vsel %vm98_vm1, 1.0, %v2462_v60  ;;  %v1614_v62 = vsel %vm100_vm0, 1.0, %v2462_v60  ;;  %vm2464_vm1 = vmmov 0  }
  0x88   :  { %v146_v63 = vadd.f32 %v1612_v61, %v2494_v2  ;;  %v148_v5 = vadd.f32 %v1614_v62, %v2489_v1  ;;  %1944 = vmatprep.mubr.msk.f32.mxu1 %vm2464_vm1, %v2462_v60 }
  0x89   :  { %v61_v0 = vpop.permute.xlu1 %60  ;;  %v55_v4 = vpop.permute.xlu0 %54 }
  0x8a   :  { %vm101_vm3 = vcmp.eq.s32.totalorder %v2598_v57, %v61_v0  ;;  %vm99_vm4 = vcmp.eq.s32.totalorder %v2598_v57, %v55_v4  ;;  %1888 = vmatprep.mubr.msk.f32.mxu0 %vm166_vm2, %v146_v63 }
  0x8b   :  { %v1613_v6 = vsel %vm99_vm4, 1.0, %v2462_v60  ;;  %v1615_v11 = vsel %vm101_vm3, 1.0, %v2462_v60  ;;  %vm576_vm4 = vcmask 523264  }
  0x8c   :  { %v147_v8 = vadd.f32 %v1613_v6, %v2507_v7  ;;  %v149_v1 = vadd.f32 %v1615_v11, %v2499_v3 }
  0x8d   :  { %v67_v12 = vpop.permute.xlu1 %66  ;;  %v64_v13 = vpop.permute.xlu0 %63 }
  0x8e   :  { %vm103_vm5 = vcmp.eq.s32.totalorder %v2598_v57, %v67_v12  ;;  %vm102_vm6 = vcmp.eq.s32.totalorder %v2598_v57, %v64_v13  ;;  %1889 = vmatmul.mubr.msk.f32.vlgmr.msra.gmra.mrb[0].mxu0 %vm166_vm2, %v147_v8 }
  0x8f   :  { %v1616_v2 = vsel %vm102_vm6, 1.0, %v2462_v60  ;;  %1891 = vmatprep.mubr.msk.f32.mxu0 %vm166_vm2, %v148_v5  ;;  %v1617_v7 = vsel %vm103_vm5, 1.0, %v2462_v60 }
  0x90   :  { %v150_v14 = vadd.f32 %v1616_v2, %v2518_v10  ;;  %v151_v20 = vadd.f32 %v1617_v7, %v2513_v9 }
  0x91   :  { %v73_v15 = vpop.permute.xlu1 %72  ;;  %v70_v16 = vpop.permute.xlu0 %69 }
  0x92   :  { %vm105_vm7 = vcmp.eq.s32.totalorder %v2598_v57, %v73_v15  ;;  %vm104_vm8 = vcmp.eq.s32.totalorder %v2598_v57, %v70_v16  ;;  %1892 = vmatmul.mubr.msk.f32.gmra.mrb[2].mxu0 %vm166_vm2, %v149_v1 }
  0x93   :  { %v1618_v19 = vsel %vm104_vm8, 1.0, %v2462_v60  ;;  %1894 = vmatprep.mubr.msk.f32.mxu0 %vm166_vm2, %v150_v14  ;;  %v1619_v10 = vsel %vm105_vm7, 1.0, %v2462_v60 }
  0x94   :  { %v152_v3 = vadd.f32 %v1618_v19, %v2530_v18  ;;  %v153_v24 = vadd.f32 %v1619_v10, %v2525_v17 }
  0x95   :  { %v79_v21 = vpop.permute.xlu1 %78  ;;  %v76_v22 = vpop.permute.xlu0 %75 }
  0x96   :  { %vm107_vm9 = vcmp.eq.s32.totalorder %v2598_v57, %v79_v21  ;;  %vm106_vm10 = vcmp.eq.s32.totalorder %v2598_v57, %v76_v22  ;;  %1895 = vmatmul.mubr.msk.f32.gmra.mrb[4].mxu0 %vm166_vm2, %v151_v20 }
  0x97   :  { %v1620_v23 = vsel %vm106_vm10, 1.0, %v2462_v60  ;;  %1897 = vmatprep.mubr.msk.f32.mxu0 %vm166_vm2, %v152_v3  ;;  %v1621_v18 = vsel %vm107_vm9, 1.0, %v2462_v60 }
  0x98   :  { %v154_v9 = vadd.f32 %v1620_v23, %v2554_v29  ;;  %v155_v30 = vadd.f32 %v1621_v18, %v2549_v28 }
  0x99   :  { %v85_v25 = vpop.permute.xlu1 %84  ;;  %v82_v26 = vpop.permute.xlu0 %81 }
  0x9a   :  { %vm109_vm11 = vcmp.eq.s32.totalorder %v2598_v57, %v85_v25  ;;  %vm108_vm12 = vcmp.eq.s32.totalorder %v2598_v57, %v82_v26  ;;  %1898 = vmatmul.mubr.msk.f32.gmra.mrb[6].mxu0 %vm166_vm2, %v153_v24 }
  0x9b   :  { %v1622_v27 = vsel %vm108_vm12, 1.0, %v2462_v60  ;;  %1900 = vmatprep.mubr.msk.f32.mxu0 %vm166_vm2, %v154_v9  ;;  %v1623_v29 = vsel %vm109_vm11, 1.0, %v2462_v60  ;;  %vm1590_vm11 = vcmask 7168  }
  0x9c   :  { %v156_v17 = vadd.f32 %v1622_v27, %v2566_v36  ;;  %v157_v34 = vadd.f32 %v1623_v29, %v2561_v35 }
  0x9d   :  { %v91_v31 = vpop.permute.xlu1 %90  ;;  %v88_v32 = vpop.permute.xlu0 %87 }
  0x9e   :  { %vm111_vm13 = vcmp.eq.s32.totalorder %v2598_v57, %v91_v31  ;;  %vm110_vm14 = vcmp.eq.s32.totalorder %v2598_v57, %v88_v32  ;;  %1901 = vmatmul.mubr.msk.f32.gmra.mrb[8].mxu0 %vm166_vm2, %v155_v30 }
  0x9f   :  { %v1624_v33 = vsel %vm110_vm14, 1.0, %v2462_v60  ;;  %1903 = vmatprep.mubr.msk.f32.mxu0 %vm166_vm2, %v156_v17  ;;  %v1625_v36 = vsel %vm111_vm13, 1.0, %v2462_v60 }
  0xa0   :  { %v158_v28 = vadd.f32 %v1624_v33, %v2578_v42  ;;  %v159_v40 = vadd.f32 %v1625_v36, %v2573_v41 }
  0xa1   :  { %v97_v37 = vpop.permute.xlu1 %96  ;;  %v94_v38 = vpop.permute.xlu0 %93 }
  0xa2   :  { %vm113_vm15 = vcmp.eq.s32.totalorder %v2598_v57, %v97_v37  ;;  %vm112_vm0 = vcmp.eq.s32.totalorder %v2598_v57, %v94_v38  ;;  %1904 = vmatmul.mubr.msk.f32.gmra.mrb[10].mxu0 %vm166_vm2, %v157_v34 }
  0xa3   :  { %v1626_v39 = vsel %vm112_vm0, 1.0, %v2462_v60  ;;  %1906 = vmatprep.mubr.msk.f32.mxu0 %vm166_vm2, %v158_v28  ;;  %v1627_v42 = vsel %vm113_vm15, 1.0, %v2462_v60 }
  0xa4   :  { %v160_v35 = vadd.f32 %v1626_v39, %v2590_v48  ;;  %v161_v43 = vadd.f32 %v1627_v42, %v2585_v47 }
  0xa6   :  { %1907 = vmatmul.mubr.msk.f32.gmra.mrb[12].mxu0 %vm166_vm2, %v159_v40 }
  0xa7   :  { %1909 = vmatprep.mubr.msk.f32.mxu0 %vm166_vm2, %v160_v35 }
  0xaa   :  { %1910 = vmatmul.mubr.msk.f32.gmra.mrb[14].mxu0 %vm166_vm2, %v161_v43 }
  0xab   :  { %1979 = vmatprep.mubr.msk.f32.mxu0 %vm2464_vm1, %v2462_v60 }
 0x161   :  { %v1890_v41 = vpop.f32.mrb[0].mxu0 }
 0x162   :  { %v2670_v45 = vmax.f32 %v1890_v41, 0.0  ;;  %v281_v46 = vpop.f32.mrb[1].mxu0 }
 0x163   :  { %v2672_v48 = vmax.f32 %v281_v46, 0.0 }
 0x164   :  { %v448_v47 = vmul.f32 %v2670_v45, %v2670_v45 }
 0x165   :  { %v447_v49 = vmul.f32 %v2672_v48, %v2672_v48  ;;  %v1893_v50 = vpop.f32.mrb[2].mxu0  ;;  %v2235_v51 = vpack.c.bf16 %v2670_v45, %v2672_v48 }
 0x166   :  { %v2680_v52 = vmax.f32 %v1893_v50, 0.0  ;;  %v291_v53 = vpop.f32.mrb[3].mxu0  ;;  %v2465_v50 = vmov 1.0  }
 0x167   :  { %v2259_v54 = vpack.c.bf16 %v448_v47, %v447_v49  ;;  %v2682_v57 = vmax.f32 %v291_v53, 0.0  ;;  %2236 = vmatpush3.bf16.msra.mxu1 %v2235_v51  ;;  %v556_v51 = vld [vmem:[%s3194_s1 + $0x20] sm:$0xff]  ;;  %v557_v53 = vld [vmem:[%s3194_s1 + $0x28] sm:$0xff] }
 0x168   :  { %v450_v58 = vmul.f32 %v2680_v52, %v2680_v52  ;;  %2237 = vmatprep.subr.bf16.mxu1 %v2463_v44 }
 0x169   :  { %v449_v59 = vmul.f32 %v2682_v57, %v2682_v57  ;;  %v1896_v61 = vpop.f32.mrb[4].mxu0  ;;  %2260 = vmatpush3.bf16.msra.mxu0 %v2259_v54  ;;  %v2238_v62 = vpack.c.bf16 %v2680_v52, %v2682_v57  ;;  %v2282_v54 = vpack.c.bf16 %v557_v53, %v556_v51 }
 0x16a   :  { %v2691_v63 = vmax.f32 %v1896_v61, 0.0  ;;  %v301_v0 = vpop.f32.mrb[5].mxu0  ;;  %2261 = vmatprep.subr.bf16.mxu0 %v2463_v44 }
 0x16b   :  { %v2262_v4 = vpack.c.bf16 %v450_v58, %v449_v59  ;;  %v2694_v5 = vmax.f32 %v301_v0, 0.0  ;;  %2239 = vmatpush3.bf16.msra.mxu1 %v2238_v62  ;;  %v558_v58 = vld [vmem:[%s3194_s1 + $0x30] sm:$0xff]  ;;  %v559_v59 = vld [vmem:[%s3194_s1 + $0x38] sm:$0xff]  ;;  %v560_v62 = vld [vmem:[%s3194_s1 + $0x40] sm:$0xff] }
 0x16c   :  { %v452_v6 = vmul.f32 %v2691_v63, %v2691_v63  ;;  %2240 = vmatprep.subr.bf16.mxu1 %v2463_v44  ;;  %v2286_v61 = vpack.c.bf16 %v559_v59, %v558_v58  ;;  %v561_v0 = vld [vmem:[%s3194_s1 + $0x48] sm:$0xff] }
 0x16d   :  { %v451_v8 = vmul.f32 %v2694_v5, %v2694_v5  ;;  %v1899_v11 = vpop.f32.mrb[6].mxu0  ;;  %2263 = vmatpush3.bf16.msra.mxu0 %v2262_v4  ;;  %v2241_v12 = vpack.c.bf16 %v2691_v63, %v2694_v5  ;;  %v2290_v4 = vpack.c.bf16 %v561_v0, %v560_v62 }
 0x16e   :  { %v2703_v13 = vmax.f32 %v1899_v11, 0.0  ;;  %v311_v2 = vpop.f32.mrb[7].mxu0  ;;  %2264 = vmatprep.subr.bf16.mxu0 %v2463_v44 }
 0x16f   :  { %v2265_v1 = vpack.c.bf16 %v452_v6, %v451_v8  ;;  %v2706_v14 = vmax.f32 %v311_v2, 0.0  ;;  %2242 = vmatpush3.bf16.msra.mxu1 %v2241_v12  ;;  %v562_v6 = vld [vmem:[%s3194_s1 + $0x50] sm:$0xff]  ;;  %v563_v8 = vld [vmem:[%s3194_s1 + $0x58] sm:$0xff] }
 0x170   :  { %v454_v7 = vmul.f32 %v2703_v13, %v2703_v13  ;;  %2243 = vmatprep.subr.bf16.mxu1 %v2463_v44  ;;  %v2294_v11 = vpack.c.bf16 %v563_v8, %v562_v6 }
 0x171   :  { %v453_v15 = vmul.f32 %v2706_v14, %v2706_v14  ;;  %v1902_v16 = vpop.f32.mrb[8].mxu0  ;;  %2266 = vmatpush3.bf16.msra.mxu0 %v2265_v1  ;;  %v2244_v19 = vpack.c.bf16 %v2703_v13, %v2706_v14 }
 0x172   :  { %v2715_v20 = vmax.f32 %v1902_v16, 0.0  ;;  %v321_v3 = vpop.f32.mrb[9].mxu0  ;;  %2267 = vmatprep.subr.bf16.mxu0 %v2463_v44 }
 0x173   :  { %v2268_v10 = vpack.c.bf16 %v454_v7, %v453_v15  ;;  %v2718_v21 = vmax.f32 %v321_v3, 0.0  ;;  %2245 = vmatpush3.bf16.msra.mxu1 %v2244_v19 }
 0x174   :  { %v456_v22 = vmul.f32 %v2715_v20, %v2715_v20  ;;  %2246 = vmatprep.subr.bf16.mxu1 %v2463_v44 }
 0x175   :  { %v455_v23 = vmul.f32 %v2718_v21, %v2718_v21  ;;  %v1905_v24 = vpop.f32.mrb[10].mxu0  ;;  %2269 = vmatpush3.bf16.msra.mxu0 %v2268_v10  ;;  %v2247_v9 = vpack.c.bf16 %v2715_v20, %v2718_v21 }
 0x176   :  { %v2727_v18 = vmax.f32 %v1905_v24, 0.0  ;;  %v331_v25 = vpop.f32.mrb[11].mxu0  ;;  %2270 = vmatprep.subr.bf16.mxu0 %v2463_v44 }
 0x177   :  { %v2271_v26 = vpack.c.bf16 %v456_v22, %v455_v23  ;;  %v2730_v27 = vmax.f32 %v331_v25, 0.0  ;;  %2248 = vmatpush3.bf16.msra.mxu1 %v2247_v9  ;;  %v2795_v22 = vshrl.u32 %v47_v55, 7  ;;  %v2800_v23 = vld [vmem:[%s3195_s2] sm:$0xff] }
 0x178   :  { %v458_v30 = vmul.f32 %v2727_v18, %v2727_v18  ;;  %2249 = vmatprep.subr.bf16.mxu1 %v2463_v44 }
 0x179   :  { %v457_v17 = vmul.f32 %v2730_v27, %v2730_v27  ;;  %v1908_v29 = vpop.f32.mrb[12].mxu0  ;;  %2272 = vmatpush3.bf16.msra.mxu0 %v2271_v26  ;;  %v2250_v31 = vpack.c.bf16 %v2727_v18, %v2730_v27  ;;  %v2803_v24 = vadd.s32 8, %v2795_v22  ;;  %v566_v9 = vsub.s32 0, %v2795_v22 }
 0x17a   :  { %v2739_v32 = vmax.f32 %v1908_v29, 0.0  ;;  %v341_v33 = vpop.f32.mrb[13].mxu0  ;;  %2273 = vmatprep.subr.bf16.mxu0 %v2463_v44  ;;  %v2807_v26 = vadd.s32 16, %v2795_v22  ;;  %vm548_vm2 = vcmp.eq.s32.totalorder %v2795_v22, %v2595_v56  ;;  %v2815_v29 = vadd.s32 24, %v2795_v22 }
 0x17b   :  { %v2274_v34 = vpack.c.bf16 %v458_v30, %v457_v17  ;;  %v2742_v28 = vmax.f32 %v341_v33, 0.0  ;;  %2251 = vmatpush3.bf16.msra.mxu1 %v2250_v31  ;;  %vm549_vm3 = vcmp.eq.s32.totalorder %v2803_v24, %v2595_v56  ;;  %v2820_v31 = vadd.s32 32, %v2795_v22 }
 0x17c   :  { %v460_v36 = vmul.f32 %v2739_v32, %v2739_v32  ;;  %2252 = vmatprep.subr.bf16.mxu1 %v2463_v44  ;;  %vm550_vm5 = vcmp.eq.s32.totalorder %v2807_v26, %v2595_v56  ;;  %vm551_vm6 = vcmp.eq.s32.totalorder %v2815_v29, %v2595_v56 }
 0x17d   :  { %v459_v37 = vmul.f32 %v2742_v28, %v2742_v28  ;;  %v1911_v38 = vpop.f32.mrb[14].mxu0  ;;  %2275 = vmatpush3.bf16.msra.mxu0 %v2274_v34  ;;  %v2253_v39 = vpack.c.bf16 %v2739_v32, %v2742_v28  ;;  %vm552_vm7 = vcmp.eq.s32.totalorder %v2820_v31, %v2595_v56 }
 0x17e   :  { %v2751_v40 = vmax.f32 %v1911_v38, 0.0  ;;  %v351_v35 = vpop.f32.mrb[15].mxu0  ;;  %2276 = vmatprep.subr.bf16.mxu0 %v2463_v44  ;;  %v2842_v38 = vadd.s32 48, %v2795_v22 }
 0x17f   :  { %v2277_v42 = vpack.c.bf16 %v460_v36, %v459_v37  ;;  %v2754_v43 = vmax.f32 %v351_v35, 0.0  ;;  %2254 = vmatpush3.bf16.msra.mxu1 %v2253_v39  ;;  %v2836_v37 = vadd.s32 40, %v2795_v22 }
 0x180   :  { %v462_v41 = vmul.f32 %v2751_v40, %v2751_v40  ;;  %2255 = vmatprep.subr.bf16.mxu1 %v2463_v44  ;;  %vm554_vm9 = vcmp.eq.s32.totalorder %v2842_v38, %v2595_v56 }
 0x181   :  { %v461_v46 = vmul.f32 %v2754_v43, %v2754_v43  ;;  %2278 = vmatpush3.bf16.msra.mxu0 %v2277_v42  ;;  %v2256_v47 = vpack.c.bf16 %v2751_v40, %v2754_v43  ;;  %vm553_vm8 = vcmp.eq.s32.totalorder %v2836_v37, %v2595_v56  ;;  %v2855_v42 = vadd.s32 56, %v2795_v22 }
 0x182   :  { %2279 = vmatprep.subr.bf16.mxu0 %v2463_v44 }
 0x183   :  { %v2280_v49 = vpack.c.bf16 %v462_v41, %v461_v46  ;;  %2257 = vmatpush3.bf16.msra.mxu1 %v2256_v47  ;;  %vm555_vm10 = vcmp.eq.s32.totalorder %v2855_v42, %v2595_v56 }
 0x184   :  { %2283 = vmatprep.subr.bf16.mxu1 %v2282_v54 }
 0x185   :  { %2281 = vmatpush3.bf16.msra.mxu0 %v2280_v49 }
 0x186   :  { %1945 = vmatmul.mubr.f32.vlgmr.msra.gmra.mrb[0].mxu1 %v2465_v50  ;;  %2326 = vmatprep.subr.bf16.mxu0 %v2463_v44 }
 0x187   :  { %2285 = vmatpush3.bf16.msra.mxu1 %v2282_v54 }
 0x188   :  { %1980 = vmatmul.mubr.f32.vlgmr.msra.gmra.mrb[16].mxu0 %v2465_v50  ;;  %2287 = vmatprep.subr.bf16.mxu1 %v2286_v61 }
 0x189   :  { %2101 = vmatprep.mubr.msk.f32.mxu0 %vm2464_vm1, %v2462_v60 }
 0x18b   :  { %2289 = vmatpush3.bf16.msra.mxu1 %v2286_v61 }
 0x18c   :  { %2291 = vmatprep.subr.bf16.mxu1 %v2290_v4 }
 0x18f   :  { %2293 = vmatpush3.bf16.msra.mxu1 %v2290_v4 }
 0x190   :  { %2295 = vmatprep.subr.bf16.mxu1 %v2294_v11 }
 0x193   :  { %2297 = vmatpush3.bf16.msra.mxu1 %v2294_v11 }
 0x194   :  { %2298 = vmatprep.subr.bf16.mxu1 %v2463_v44 }
 0x259   :  { %v442_v12 = vpop.f32.mrb[0].mxu1 }
 0x25a   :  { %v446_v2 = vmul.f32 0.0078125, %v442_v12  ;;  %v1946_v1 = vpop.f32.mrb[1].mxu1 }
 0x25b   :  { %v529_v7 = vpop.f32.mrb[16].mxu0 }
 0x25c   :  { %v534_v15 = vmul.f32 %v446_v2, %v446_v2  ;;  %v533_v16 = vmul.f32 0.0078125, %v529_v7  ;;  %v1981_v19 = vpop.f32.mrb[17].mxu0 }
 0x25e   :  { %v535_v3 = vsub.f32 %v533_v16, %v534_v15 }
 0x260   :  { %v536_v10 = vadd.f32 1e-05, %v535_v3 }
 0x262   :  { %2457 = vrsqrt.f32 %v536_v10 }
 0x26c   :  { %v2458_v25 = vpop.eup %2457 }
 0x26d   :  { %v538_v30 = vmul.f32 %v2458_v25, %v2800_v23 }
 0x26f   :  { %v567_v55 = vrot.slane %v538_v30, %v566_v9  ;;  %v706_v17 = vmul.f32 %v538_v30, %v446_v2 }
 0x271   :  { %v568_v33 = vsel %vm548_vm2, %v567_v55, 0.0  ;;  %v569_v34 = vsel %vm549_vm3, %v567_v55, 0.0  ;;  %v570_v36 = vsel %vm550_vm5, %v567_v55, 0.0  ;;  %v571_v39 = vsel %vm551_vm6, %v567_v55, 0.0 }
 0x272   :  { %1998 = vmatprep.mubr.msk.f32.mxu1 %vm576_vm4, %v568_v33  ;;  %v572_v35 = vsel %vm552_vm7, %v567_v55, 0.0  ;;  %v573_v41 = vsel %vm553_vm8, %v567_v55, 0.0  ;;  %v574_v46 = vsel %vm554_vm9, %v567_v55, 0.0  ;;  %v575_v47 = vsel %vm555_vm10, %v567_v55, 0.0 }
 0x273   :  { %1999 = vmatmul.mubr.msk.f32.vlgmr.msra.gmra.mrb[2].mxu1 %vm576_vm4, %v569_v34 }
 0x274   :  { %2001 = vmatprep.mubr.msk.f32.mxu1 %vm576_vm4, %v570_v36  ;;  %2300 = vmatpush3.bf16.msra.mxu1 %v2282_v54 }
 0x275   :  { %2301 = vmatprep.subr.bf16.mxu1 %v2463_v44 }
 0x277   :  { %2002 = vmatmul.mubr.msk.f32.gmra.mrb[4].mxu1 %vm576_vm4, %v571_v39 }
 0x278   :  { %2004 = vmatprep.mubr.msk.f32.mxu1 %vm576_vm4, %v572_v35  ;;  %2303 = vmatpush3.bf16.msra.mxu1 %v2286_v61 }
 0x279   :  { %2304 = vmatprep.subr.bf16.mxu1 %v2463_v44 }
 0x27b   :  { %2005 = vmatmul.mubr.msk.f32.gmra.mrb[6].mxu1 %vm576_vm4, %v573_v41 }
 0x27c   :  { %2007 = vmatprep.mubr.msk.f32.mxu1 %vm576_vm4, %v574_v46  ;;  %2306 = vmatpush3.bf16.msra.mxu1 %v2290_v4 }
 0x27d   :  { %2307 = vmatprep.subr.bf16.mxu1 %v2463_v44 }
 0x27f   :  { %2008 = vmatmul.mubr.msk.f32.gmra.mrb[8].mxu1 %vm576_vm4, %v575_v47 }
 0x280   :  { %2309 = vmatpush3.bf16.msra.mxu1 %v2294_v11  ;;  %2026 = vmatprep.mubr.msk.f32.mxu1 %vm2464_vm1, %v2462_v60 }
 0x283   :  { %2027 = vmatmul.mubr.msk.f32.vlgmr.msra.gmra.mrb[10].mxu1 %vm576_vm4, %v706_v17 }
 0x284   :  { %2045 = vmatprep.mubr.msk.f32.mxu1 %vm576_vm4, %v2672_v48 }
 0x346   :  { %v2000_v49 = vpop.f32.mrb[2].mxu1 }
 0x347   :  { %v667_v51 = vpop.f32.mrb[3].mxu1 }
 0x348   :  { %v2310_v53 = vpack.c.bf16 %v2000_v49, %v667_v51 }
 0x34a   :  { %v2003_v54 = vpop.f32.mrb[4].mxu1  ;;  %2311 = vmatprep.subr.bf16.mxu1 %v2310_v53 }
 0x34b   :  { %v677_v58 = vpop.f32.mrb[5].mxu1  ;;  %2313 = vmatpush3.bf16.msra.mxu1 %v2310_v53 }
 0x34c   :  { %v2314_v59 = vpack.c.bf16 %v2003_v54, %v677_v58 }
 0x34e   :  { %v2006_v61 = vpop.f32.mrb[6].mxu1  ;;  %2315 = vmatprep.subr.bf16.mxu1 %v2314_v59 }
 0x34f   :  { %v687_v62 = vpop.f32.mrb[7].mxu1  ;;  %2317 = vmatpush3.bf16.msra.mxu1 %v2314_v59 }
 0x350   :  { %v2318_v0 = vpack.c.bf16 %v2006_v61, %v687_v62 }
 0x352   :  { %v2009_v4 = vpop.f32.mrb[8].mxu1  ;;  %2319 = vmatprep.subr.bf16.mxu1 %v2318_v0 }
 0x353   :  { %v697_v6 = vpop.f32.mrb[9].mxu1  ;;  %2321 = vmatpush3.bf16.msra.mxu1 %v2318_v0 }
 0x354   :  { %v2322_v8 = vpack.c.bf16 %v2009_v4, %v697_v6 }
 0x356   :  { %v776_v11 = vpop.f32.mrb[10].mxu1  ;;  %2323 = vmatprep.subr.bf16.mxu1 %v2322_v8 }
 0x357   :  { %v2028_v48 = vpop.f32.mrb[11].mxu1  ;;  %2325 = vmatpush3.bf16.msra.mxu1 %v2322_v8 }
 0x358   :  { %2350 = vmatprep.subr.bf16.mxu1 %v2463_v44 }
 0x35a   :  { %2046 = vmatmul.mubr.msk.f32.vlgmr.msra.gmra.mrb[12].mxu1 %vm576_vm4, %v2670_v45  ;;  %v781_v45 = vrot.slane %v776_v11, 6 }
 0x35b   :  { %2048 = vmatprep.mubr.msk.f32.mxu1 %vm576_vm4, %v2682_v57  ;;  %v786_v57 = vsub.s32 2, %v2795_v22 }
 0x35e   :  { %2049 = vmatmul.mubr.msk.f32.gmra.mrb[14].mxu1 %vm576_vm4, %v2680_v52  ;;  %v783_v52 = vsub.f32 %v2800_v23, %v781_v45 }
 0x35f   :  { %2051 = vmatprep.mubr.msk.f32.mxu1 %vm576_vm4, %v2694_v5 }
 0x362   :  { %2052 = vmatmul.mubr.msk.f32.gmra.mrb[16].mxu1 %vm576_vm4, %v2691_v63  ;;  %v2916_v63 = vrot.slane %v783_v52, %v786_v57 }
 0x363   :  { %2054 = vmatprep.mubr.msk.f32.mxu1 %vm576_vm4, %v2706_v14 }
 0x366   :  { %2055 = vmatmul.mubr.msk.f32.gmra.mrb[18].mxu1 %vm576_vm4, %v2703_v13 }
 0x367   :  { %2057 = vmatprep.mubr.msk.f32.mxu1 %vm576_vm4, %v2718_v21 }
 0x36a   :  { %2058 = vmatmul.mubr.msk.f32.gmra.mrb[20].mxu1 %vm576_vm4, %v2715_v20 }
 0x36b   :  { %2060 = vmatprep.mubr.msk.f32.mxu1 %vm576_vm4, %v2730_v27 }
 0x36e   :  { %2061 = vmatmul.mubr.msk.f32.gmra.mrb[22].mxu1 %vm576_vm4, %v2727_v18 }
 0x36f   :  { %2063 = vmatprep.mubr.msk.f32.mxu1 %vm576_vm4, %v2742_v28 }
 0x372   :  { %2064 = vmatmul.mubr.msk.f32.gmra.mrb[24].mxu1 %vm576_vm4, %v2739_v32 }
 0x373   :  { %2066 = vmatprep.mubr.msk.f32.mxu1 %vm576_vm4, %v2754_v43 }
 0x376   :  { %2067 = vmatmul.mubr.msk.f32.gmra.mrb[26].mxu1 %vm576_vm4, %v2751_v40 }
 0x377   :  { %2136 = vmatprep.mubr.msk.f32.mxu1 %vm2464_vm1, %v2462_v60 }
 0x42d   :  { %v2047_v5 = vpop.f32.mrb[12].mxu1 }
 0x42e   :  { %v908_v13 = vadd.f32 %v2047_v5, %v2916_v63  ;;  %v902_v14 = vpop.f32.mrb[13].mxu1 }
 0x42f   :  { %v903_v20 = vadd.f32 %v902_v14, %v2916_v63 }
 0x430   :  { %v2920_v21 = vmax.f32 %v908_v13, 0.0 }
 0x431   :  { %v2922_v18 = vmax.f32 %v903_v20, 0.0  ;;  %v2050_v27 = vpop.f32.mrb[14].mxu1 }
 0x432   :  { %v1069_v32 = vmul.f32 %v2920_v21, %v2920_v21  ;;  %v918_v28 = vadd.f32 %v2050_v27, %v2916_v63  ;;  %v912_v40 = vpop.f32.mrb[15].mxu1 }
 0x433   :  { %v2327_v43 = vpack.c.bf16 %v2920_v21, %v2922_v18  ;;  %v1068_v12 = vmul.f32 %v2922_v18, %v2922_v18  ;;  %v913_v2 = vadd.f32 %v912_v40, %v2916_v63 }
 0x434   :  { %v2932_v1 = vmax.f32 %v918_v28, 0.0 }
 0x435   :  { %v2934_v7 = vmax.f32 %v913_v2, 0.0  ;;  %v2053_v15 = vpop.f32.mrb[16].mxu1  ;;  %2328 = vmatpush3.bf16.msra.mxu0 %v2327_v43  ;;  %v2351_v16 = vpack.c.bf16 %v1069_v32, %v1068_v12 }
 0x436   :  { %v1071_v19 = vmul.f32 %v2932_v1, %v2932_v1  ;;  %v928_v3 = vadd.f32 %v2053_v15, %v2916_v63  ;;  %v922_v10 = vpop.f32.mrb[17].mxu1  ;;  %2329 = vmatprep.subr.bf16.mxu0 %v2463_v44 }
 0x437   :  { %v2330_v9 = vpack.c.bf16 %v2932_v1, %v2934_v7  ;;  %v1070_v25 = vmul.f32 %v2934_v7, %v2934_v7  ;;  %v923_v30 = vadd.f32 %v922_v10, %v2916_v63  ;;  %2352 = vmatpush3.bf16.msra.mxu1 %v2351_v16 }
 0x438   :  { %v2945_v55 = vmax.f32 %v928_v3, 0.0  ;;  %2353 = vmatprep.subr.bf16.mxu1 %v2463_v44 }
 0x439   :  { %v2948_v17 = vmax.f32 %v923_v30, 0.0  ;;  %v2056_v33 = vpop.f32.mrb[18].mxu1  ;;  %2331 = vmatpush3.bf16.msra.mxu0 %v2330_v9  ;;  %v2354_v34 = vpack.c.bf16 %v1071_v19, %v1070_v25 }
 0x43a   :  { %v1073_v36 = vmul.f32 %v2945_v55, %v2945_v55  ;;  %v938_v39 = vadd.f32 %v2056_v33, %v2916_v63  ;;  %v932_v35 = vpop.f32.mrb[19].mxu1  ;;  %2332 = vmatprep.subr.bf16.mxu0 %v2463_v44 }
 0x43b   :  { %v2333_v41 = vpack.c.bf16 %v2945_v55, %v2948_v17  ;;  %v1072_v46 = vmul.f32 %v2948_v17, %v2948_v17  ;;  %v933_v47 = vadd.f32 %v932_v35, %v2916_v63  ;;  %2355 = vmatpush3.bf16.msra.mxu1 %v2354_v34 }
 0x43c   :  { %v2959_v49 = vmax.f32 %v938_v39, 0.0  ;;  %2356 = vmatprep.subr.bf16.mxu1 %v2463_v44 }
 0x43d   :  { %v2962_v51 = vmax.f32 %v933_v47, 0.0  ;;  %v2059_v53 = vpop.f32.mrb[20].mxu1  ;;  %2334 = vmatpush3.bf16.msra.mxu0 %v2333_v41  ;;  %v2357_v54 = vpack.c.bf16 %v1073_v36, %v1072_v46 }
 0x43e   :  { %v1075_v58 = vmul.f32 %v2959_v49, %v2959_v49  ;;  %v948_v59 = vadd.f32 %v2059_v53, %v2916_v63  ;;  %v942_v61 = vpop.f32.mrb[21].mxu1  ;;  %2335 = vmatprep.subr.bf16.mxu0 %v2463_v44 }
 0x43f   :  { %v2336_v62 = vpack.c.bf16 %v2959_v49, %v2962_v51  ;;  %v1074_v0 = vmul.f32 %v2962_v51, %v2962_v51  ;;  %v943_v4 = vadd.f32 %v942_v61, %v2916_v63  ;;  %2358 = vmatpush3.bf16.msra.mxu1 %v2357_v54 }
 0x440   :  { %v2973_v6 = vmax.f32 %v948_v59, 0.0  ;;  %2359 = vmatprep.subr.bf16.mxu1 %v2463_v44  ;;  %v1164_v59 = vld [vmem:[%s3194_s1 + $0x68] sm:$0xff] }
 0x441   :  { %v2976_v8 = vmax.f32 %v943_v4, 0.0  ;;  %v2062_v11 = vpop.f32.mrb[22].mxu1  ;;  %2337 = vmatpush3.bf16.msra.mxu0 %v2336_v62  ;;  %v2360_v48 = vpack.c.bf16 %v1075_v58, %v1074_v0  ;;  %v1163_v58 = vld [vmem:[%s3194_s1 + $0x60] sm:$0xff]  ;;  %v1165_v62 = vld [vmem:[%s3194_s1 + $0x70] sm:$0xff]  ;;  %v1168_v4 = vld [vmem:[%s3194_s1 + $0x88] sm:$0xff] }
 0x442   :  { %v1077_v45 = vmul.f32 %v2973_v6, %v2973_v6  ;;  %v958_v52 = vadd.f32 %v2062_v11, %v2916_v63  ;;  %v952_v57 = vpop.f32.mrb[23].mxu1  ;;  %2338 = vmatprep.subr.bf16.mxu0 %v2463_v44  ;;  %v2374_v61 = vpack.c.bf16 %v1164_v59, %v1163_v58  ;;  %v1167_v0 = vld [vmem:[%s3194_s1 + $0x80] sm:$0xff] }
 0x443   :  { %v2339_v5 = vpack.c.bf16 %v2973_v6, %v2976_v8  ;;  %v1076_v13 = vmul.f32 %v2976_v8, %v2976_v8  ;;  %v953_v14 = vadd.f32 %v952_v57, %v2916_v63  ;;  %2361 = vmatpush3.bf16.msra.mxu1 %v2360_v48  ;;  %v2382_v11 = vpack.c.bf16 %v1168_v4, %v1167_v0  ;;  %v1169_v48 = vld [vmem:[%s3194_s1 + $0x90] sm:$0xff] }
 0x444   :  { %v2987_v20 = vmax.f32 %v958_v52, 0.0  ;;  %2362 = vmatprep.subr.bf16.mxu1 %v2463_v44 }
 0x445   :  { %v2990_v27 = vmax.f32 %v953_v14, 0.0  ;;  %v2065_v32 = vpop.f32.mrb[24].mxu1  ;;  %2340 = vmatpush3.bf16.msra.mxu0 %v2339_v5  ;;  %v2363_v28 = vpack.c.bf16 %v1077_v45, %v1076_v13  ;;  %v1170_v45 = vld [vmem:[%s3194_s1 + $0x98] sm:$0xff] }
 0x446   :  { %v1079_v40 = vmul.f32 %v2987_v20, %v2987_v20  ;;  %v968_v43 = vadd.f32 %v2065_v32, %v2916_v63  ;;  %v962_v12 = vpop.f32.mrb[25].mxu1  ;;  %2341 = vmatprep.subr.bf16.mxu0 %v2463_v44  ;;  %v2386_v52 = vpack.c.bf16 %v1170_v45, %v1169_v48 }
 0x447   :  { %v2342_v2 = vpack.c.bf16 %v2987_v20, %v2990_v27  ;;  %v1078_v15 = vmul.f32 %v2990_v27, %v2990_v27  ;;  %v963_v16 = vadd.f32 %v962_v12, %v2916_v63  ;;  %2364 = vmatpush3.bf16.msra.mxu1 %v2363_v28 }
 0x448   :  { %v3001_v19 = vmax.f32 %v968_v43, 0.0  ;;  %2365 = vmatprep.subr.bf16.mxu1 %v2463_v44 }
 0x449   :  { %v3004_v3 = vmax.f32 %v963_v16, 0.0  ;;  %v2068_v10 = vpop.f32.mrb[26].mxu1  ;;  %2343 = vmatpush3.bf16.msra.mxu0 %v2342_v2  ;;  %v2366_v9 = vpack.c.bf16 %v1079_v40, %v1078_v15  ;;  %v1173_v16 = vsub.s32 1, %v2795_v22 }
 0x44a   :  { %v1081_v25 = vmul.f32 %v3001_v19, %v3001_v19  ;;  %v978_v30 = vadd.f32 %v2068_v10, %v2916_v63  ;;  %v972_v33 = vpop.f32.mrb[27].mxu1  ;;  %2344 = vmatprep.subr.bf16.mxu0 %v2463_v44 }
 0x44b   :  { %v2345_v34 = vpack.c.bf16 %v3001_v19, %v3004_v3  ;;  %v1080_v36 = vmul.f32 %v3004_v3, %v3004_v3  ;;  %v973_v39 = vadd.f32 %v972_v33, %v2916_v63  ;;  %2367 = vmatpush3.bf16.msra.mxu1 %v2366_v9 }
 0x44c   :  { %v3015_v35 = vmax.f32 %v978_v30, 0.0  ;;  %2368 = vmatprep.subr.bf16.mxu1 %v2463_v44 }
 0x44d   :  { %v3018_v41 = vmax.f32 %v973_v39, 0.0  ;;  %2346 = vmatpush3.bf16.msra.mxu0 %v2345_v34  ;;  %v2369_v46 = vpack.c.bf16 %v1081_v25, %v1080_v36 }
 0x44e   :  { %v1083_v47 = vmul.f32 %v3015_v35, %v3015_v35  ;;  %2347 = vmatprep.subr.bf16.mxu0 %v2463_v44 }
 0x44f   :  { %v2348_v53 = vpack.c.bf16 %v3015_v35, %v3018_v41  ;;  %v1082_v63 = vmul.f32 %v3018_v41, %v3018_v41  ;;  %2370 = vmatpush3.bf16.msra.mxu1 %v2369_v46 }
 0x450   :  { %2371 = vmatprep.subr.bf16.mxu1 %v2463_v44 }
 0x451   :  { %2349 = vmatpush3.bf16.msra.mxu0 %v2348_v53  ;;  %v2372_v54 = vpack.c.bf16 %v1083_v47, %v1082_v63 }
 0x452   :  { %2375 = vmatprep.subr.bf16.mxu0 %v2374_v61 }
 0x453   :  { %2373 = vmatpush3.bf16.msra.mxu1 %v2372_v54 }
 0x454   :  { %2102 = vmatmul.mubr.f32.vlgmr.msra.gmra.mrb[18].mxu0 %v2465_v50  ;;  %2390 = vmatprep.subr.bf16.mxu1 %v2463_v44 }
 0x455   :  { %2377 = vmatpush3.bf16.msra.mxu0 %v2374_v61 }
 0x456   :  { %2137 = vmatmul.mubr.f32.vlgmr.msra.gmra.mrb[28].mxu1 %v2465_v50 }
 0x457   :  { %2183 = vmatprep.mubr.msk.f32.mxu1 %vm2464_vm1, %v2462_v60  ;;  %2392 = vmatpush3.bf16.msra.mxu1 %v2374_v61  ;;  %v1166_v60 = vld [vmem:[%s3194_s1 + $0x78] sm:$0xff] }
 0x458   :  { %2393 = vmatprep.subr.bf16.mxu1 %v2463_v44  ;;  %v2378_v50 = vpack.c.bf16 %v1166_v60, %v1165_v62 }
 0x45a   :  { %2379 = vmatprep.subr.bf16.mxu0 %v2378_v50 }
 0x45b   :  { %2395 = vmatpush3.bf16.msra.mxu1 %v2378_v50  ;;  %2381 = vmatpush3.bf16.msra.mxu0 %v2378_v50 }
 0x45c   :  { %2396 = vmatprep.subr.bf16.mxu1 %v2463_v44  ;;  %2383 = vmatprep.subr.bf16.mxu0 %v2382_v11 }
 0x45f   :  { %2398 = vmatpush3.bf16.msra.mxu1 %v2382_v11  ;;  %2385 = vmatpush3.bf16.msra.mxu0 %v2382_v11 }
 0x460   :  { %2399 = vmatprep.subr.bf16.mxu1 %v2463_v44  ;;  %2387 = vmatprep.subr.bf16.mxu0 %v2386_v52 }
 0x463   :  { %2401 = vmatpush3.bf16.msra.mxu1 %v2386_v52  ;;  %2389 = vmatpush3.bf16.msra.mxu0 %v2386_v52 }
 0x527   :  { %v1063_v57 = vpop.f32.mrb[18].mxu0 }
 0x528   :  { %v1067_v5 = vmul.f32 0.0078125, %v1063_v57  ;;  %v2103_v13 = vpop.f32.mrb[19].mxu0 }
 0x529   :  { %v1150_v14 = vpop.f32.mrb[28].mxu1 }
 0x52a   :  { %v1155_v32 = vmul.f32 %v1067_v5, %v1067_v5  ;;  %v1154_v28 = vmul.f32 0.0078125, %v1150_v14  ;;  %v2138_v40 = vpop.f32.mrb[29].mxu1 }
 0x52c   :  { %v1156_v43 = vsub.f32 %v1154_v28, %v1155_v32 }
 0x52e   :  { %v1157_v12 = vadd.f32 1e-05, %v1156_v43 }
 0x530   :  { %2459 = vrsqrt.f32 %v1157_v12 }
 0x53a   :  { %v2460_v2 = vpop.eup %2459 }
 0x53b   :  { %v1160_v15 = vrot.slane %v2460_v2, 7 }
 0x53d   :  { %v1162_v44 = vmul.f32 %v1160_v15, %v2800_v23 }
 0x53f   :  { %v1174_v10 = vrot.slane %v1162_v44, %v1173_v16  ;;  %v1313_v9 = vrot.slane %v1162_v44, 1 }
 0x541   :  { %v1175_v25 = vsel %vm548_vm2, %v1174_v10, 0.0  ;;  %v1176_v30 = vsel %vm549_vm3, %v1174_v10, 0.0  ;;  %v1315_v33 = vmul.f32 %v1313_v9, %v1067_v5  ;;  %v1177_v34 = vsel %vm550_vm5, %v1174_v10, 0.0 }
 0x542   :  { %2155 = vmatprep.mubr.msk.f32.mxu0 %vm576_vm4, %v1175_v25  ;;  %v1178_v36 = vsel %vm551_vm6, %v1174_v10, 0.0  ;;  %v1179_v24 = vsel %vm552_vm7, %v1174_v10, 0.0  ;;  %v1180_v39 = vsel %vm553_vm8, %v1174_v10, 0.0  ;;  %v1181_v26 = vsel %vm554_vm9, %v1174_v10, 0.0 }
 0x543   :  { %2156 = vmatmul.mubr.msk.f32.vlgmr.msra.gmra.mrb[20].mxu0 %vm576_vm4, %v1176_v30  ;;  %2184 = vmatmul.mubr.msk.f32.vlgmr.msra.gmra.mrb[30].mxu1 %vm576_vm4, %v1315_v33  ;;  %v1182_v29 = vsel %vm555_vm10, %v1174_v10, 0.0 }
 0x544   :  { %2158 = vmatprep.mubr.msk.f32.mxu0 %vm576_vm4, %v1177_v34 }
 0x547   :  { %2159 = vmatmul.mubr.msk.f32.gmra.mrb[22].mxu0 %vm576_vm4, %v1178_v36 }
 0x548   :  { %2161 = vmatprep.mubr.msk.f32.mxu0 %vm576_vm4, %v1179_v24 }
 0x54b   :  { %2162 = vmatmul.mubr.msk.f32.gmra.mrb[24].mxu0 %vm576_vm4, %v1180_v39 }
 0x54c   :  { %2164 = vmatprep.mubr.msk.f32.mxu0 %vm576_vm4, %v1181_v26 }
 0x54f   :  { %2165 = vmatmul.mubr.msk.f32.gmra.mrb[26].mxu0 %vm576_vm4, %v1182_v29 }
 0x550   :  { %2202 = vmatprep.mubr.msk.f32.mxu0 %vm576_vm4, %v2922_v18 }
 0x616   :  { %v2157_v31 = vpop.f32.mrb[20].mxu0  ;;  %v1385_v37 = vpop.f32.mrb[30].mxu1 }
 0x617   :  { %v1273_v46 = vpop.f32.mrb[21].mxu0  ;;  %v2185_v47 = vpop.f32.mrb[31].mxu1 }
 0x618   :  { %v2402_v53 = vpack.c.bf16 %v2157_v31, %v1273_v46 }
 0x61a   :  { %v2160_v63 = vpop.f32.mrb[22].mxu0  ;;  %2403 = vmatprep.subr.bf16.mxu0 %v2402_v53 }
 0x61b   :  { %v1283_v38 = vpop.f32.mrb[23].mxu0  ;;  %2405 = vmatpush3.bf16.msra.mxu0 %v2402_v53 }
 0x61c   :  { %v2406_v54 = vpack.c.bf16 %v2160_v63, %v1283_v38 }
 0x61e   :  { %v2163_v58 = vpop.f32.mrb[24].mxu0  ;;  %2407 = vmatprep.subr.bf16.mxu0 %v2406_v54 }
 0x61f   :  { %v1293_v59 = vpop.f32.mrb[25].mxu0  ;;  %2409 = vmatpush3.bf16.msra.mxu0 %v2406_v54 }
 0x620   :  { %v2410_v56 = vpack.c.bf16 %v2163_v58, %v1293_v59 }
 0x622   :  { %v2166_v42 = vpop.f32.mrb[26].mxu0  ;;  %2411 = vmatprep.subr.bf16.mxu0 %v2410_v56 }
 0x623   :  { %v1303_v61 = vpop.f32.mrb[27].mxu0  ;;  %2413 = vmatpush3.bf16.msra.mxu0 %v2410_v56 }
 0x624   :  { %v2414_v18 = vpack.c.bf16 %v2166_v42, %v1303_v61 }
 0x626   :  { %2415 = vmatprep.subr.bf16.mxu0 %v2414_v18 }
 0x627   :  { %2417 = vmatpush3.bf16.msra.mxu0 %v2414_v18 }
 0x62a   :  { %2203 = vmatmul.mubr.msk.f32.vlgmr.msra.gmra.mrb[28].mxu0 %vm576_vm4, %v2920_v21  ;;  %v1390_v21 = vrot.slane %v1385_v37, 5 }
 0x62b   :  { %2205 = vmatprep.mubr.msk.f32.mxu0 %vm576_vm4, %v2934_v7  ;;  %v1395_v7 = vsub.s32 3, %v2795_v22 }
 0x62e   :  { %2206 = vmatmul.mubr.msk.f32.gmra.mrb[30].mxu0 %vm576_vm4, %v2932_v1  ;;  %v1392_v1 = vsub.f32 %v2800_v23, %v1390_v21 }
 0x62f   :  { %2208 = vmatprep.mubr.msk.f32.mxu0 %vm576_vm4, %v2948_v17 }
 0x632   :  { %2209 = vmatmul.mubr.msk.f32.gmra.mrb[32].mxu0 %vm576_vm4, %v2945_v55  ;;  %v1396_v55 = vrot.slane %v1392_v1, %v1395_v7 }
 0x633   :  { %2211 = vmatprep.mubr.msk.f32.mxu0 %vm576_vm4, %v2962_v51 }
 0x636   :  { %2212 = vmatmul.mubr.msk.f32.gmra.mrb[34].mxu0 %vm576_vm4, %v2959_v49 }
 0x637   :  { %2214 = vmatprep.mubr.msk.f32.mxu0 %vm576_vm4, %v2976_v8 }
 0x63a   :  { %2215 = vmatmul.mubr.msk.f32.gmra.mrb[36].mxu0 %vm576_vm4, %v2973_v6 }
 0x63b   :  { %2217 = vmatprep.mubr.msk.f32.mxu0 %vm576_vm4, %v2990_v27 }
 0x63e   :  { %2218 = vmatmul.mubr.msk.f32.gmra.mrb[38].mxu0 %vm576_vm4, %v2987_v20 }
 0x63f   :  { %2220 = vmatprep.mubr.msk.f32.mxu0 %vm576_vm4, %v3004_v3 }
 0x642   :  { %2221 = vmatmul.mubr.msk.f32.gmra.mrb[40].mxu0 %vm576_vm4, %v3001_v19 }
 0x643   :  { %2223 = vmatprep.mubr.msk.f32.mxu0 %vm576_vm4, %v3018_v41 }
 0x646   :  { %2224 = vmatmul.mubr.msk.f32.gmra.mrb[42].mxu0 %vm576_vm4, %v3015_v35 }
 0x6fd   :  { %v2204_v17 = vpop.f32.mrb[28].mxu0 }
 0x6fe   :  { %v1517_v49 = vadd.f32 %v2204_v17, %v1396_v55  ;;  %v1511_v51 = vpop.f32.mrb[29].mxu0 }
 0x6ff   :  { %v1512_v6 = vadd.f32 %v1511_v51, %v1396_v55 }
 0x700   :  { %1592 = vst.msk [vmem:[%s3196_s3 + $0x8] sm:$0xff] %vm1590_vm11, %v1517_v49 }
 0x701   :  { %1591 = vst.msk [vmem:[%s3196_s3] sm:$0xff] %vm1590_vm11, %v1512_v6  ;;  %v2207_v8 = vpop.f32.mrb[30].mxu0 }
 0x702   :  { %v1527_v23 = vadd.f32 %v2207_v8, %v1396_v55  ;;  %v1521_v20 = vpop.f32.mrb[31].mxu0 }
 0x703   :  { %v1522_v22 = vadd.f32 %v1521_v20, %v1396_v55 }
 0x704   :  { %1594 = vst.msk [vmem:[%s3196_s3 + $0x18] sm:$0xff] %vm1590_vm11, %v1527_v23 }
 0x705   :  { %1593 = vst.msk [vmem:[%s3196_s3 + $0x10] sm:$0xff] %vm1590_vm11, %v1522_v22  ;;  %v2210_v27 = vpop.f32.mrb[32].mxu0 }
 0x706   :  { %v1537_v19 = vadd.f32 %v2210_v27, %v1396_v55  ;;  %v1531_v3 = vpop.f32.mrb[33].mxu0 }
 0x707   :  { %v1532_v35 = vadd.f32 %v1531_v3, %v1396_v55 }
 0x708   :  { %1596 = vst.msk [vmem:[%s3196_s3 + $0x28] sm:$0xff] %vm1590_vm11, %v1537_v19 }
 0x709   :  { %1595 = vst.msk [vmem:[%s3196_s3 + $0x20] sm:$0xff] %vm1590_vm11, %v1532_v35  ;;  %v2213_v41 = vpop.f32.mrb[34].mxu0 }
 0x70a   :  { %v1547_v62 = vadd.f32 %v2213_v41, %v1396_v55  ;;  %v1541_v60 = vpop.f32.mrb[35].mxu0 }
 0x70b   :  { %v1542_v50 = vadd.f32 %v1541_v60, %v1396_v55 }
 0x70c   :  { %1598 = vst.msk [vmem:[%s3196_s3 + $0x38] sm:$0xff] %vm1590_vm11, %v1547_v62 }
 0x70d   :  { %1597 = vst.msk [vmem:[%s3196_s3 + $0x30] sm:$0xff] %vm1590_vm11, %v1542_v50  ;;  %v2216_v0 = vpop.f32.mrb[36].mxu0 }
 0x70e   :  { %v1557_v4 = vadd.f32 %v2216_v0, %v1396_v55  ;;  %v1551_v11 = vpop.f32.mrb[37].mxu0 }
 0x70f   :  { %v1552_v48 = vadd.f32 %v1551_v11, %v1396_v55 }
 0x710   :  { %1600 = vst.msk [vmem:[%s3196_s3 + $0x48] sm:$0xff] %vm1590_vm11, %v1557_v4 }
 0x711   :  { %1599 = vst.msk [vmem:[%s3196_s3 + $0x40] sm:$0xff] %vm1590_vm11, %v1552_v48  ;;  %v2219_v45 = vpop.f32.mrb[38].mxu0 }
 0x712   :  { %v1567_v52 = vadd.f32 %v2219_v45, %v1396_v55  ;;  %v1561_v57 = vpop.f32.mrb[39].mxu0 }
 0x713   :  { %v1562_v5 = vadd.f32 %v1561_v57, %v1396_v55 }
 0x714   :  { %1602 = vst.msk [vmem:[%s3196_s3 + $0x58] sm:$0xff] %vm1590_vm11, %v1567_v52 }
 0x715   :  { %1601 = vst.msk [vmem:[%s3196_s3 + $0x50] sm:$0xff] %vm1590_vm11, %v1562_v5  ;;  %v2222_v13 = vpop.f32.mrb[40].mxu0 }
 0x716   :  { %v1577_v14 = vadd.f32 %v2222_v13, %v1396_v55  ;;  %v1571_v32 = vpop.f32.mrb[41].mxu0 }
 0x717   :  { %v1572_v28 = vadd.f32 %v1571_v32, %v1396_v55 }
 0x718   :  { %1604 = vst.msk [vmem:[%s3196_s3 + $0x68] sm:$0xff] %vm1590_vm11, %v1577_v14 }
 0x719   :  { %1603 = vst.msk [vmem:[%s3196_s3 + $0x60] sm:$0xff] %vm1590_vm11, %v1572_v28  ;;  %v2225_v40 = vpop.f32.mrb[42].mxu0 }
 0x71a   :  { %v1587_v43 = vadd.f32 %v2225_v40, %v1396_v55  ;;  %v1581_v12 = vpop.f32.mrb[43].mxu0 }
 0x71b   :  { %v1582_v2 = vadd.f32 %v1581_v12, %v1396_v55 }
 0x71c   :  { %1606 = vst.msk [vmem:[%s3196_s3 + $0x78] sm:$0xff] %vm1590_vm11, %v1587_v43 }
 0x71d   :  { %1605 = vst.msk [vmem:[%s3196_s3 + $0x70] sm:$0xff] %vm1590_vm11, %v1582_v2 }

</bundles_post_ra>
